<compile_context>
chip_gen: v7x
topology: tpu7x:2x2x1
jax: 0.10.0
libtpu: 0.0.40
codegen_flags: <defaults>
</compile_context>

<pallas_src>
import jax
import jax.numpy as jnp
from jax.experimental import pallas as pl
from jax.experimental.pallas import tpu as pltpu

_LANE = 128
_SUBLANE = 8
_BN_EPS = 1e-5


def _round_up(n, m):
    return ((n + m - 1) // m) * m


def subnet_bandpower_kernel(x_ref, w_ref, p_ref, o_ref):
    # Linear on the MXU: x [Bp, K] @ W^T [K, Hp] -> [Bp, Hp] (Hp lane-dense).
    y = jnp.dot(x_ref[...], w_ref[...], preferred_element_type=jnp.float32)
    bias = p_ref[0:1, :]     # packed per-feature constants, one (8, Hp) tile
    scale = p_ref[1:2, :]    # gamma / sqrt(var + eps)   (pre-folded)
    shift = p_ref[2:3, :]    # beta - mean * scale       (pre-folded)
    y = jnp.maximum(y + bias, 0.0)                       # bias + ReLU (VPU)
    # BatchNorm (eval) as a single affine; dropout = identity in eval mode.
    o_ref[...] = (y * scale + shift).astype(o_ref.dtype)


def subnetwork_bandpower(x, w, b, gamma, beta, running_mean, running_var,
                         *, eps=_BN_EPS):
    """Fused Linear -> ReLU -> BatchNorm1d(eval) -> Dropout(eval = identity).

    x: [B, F_in] f32; w: [H, F_in] (PyTorch nn.Linear layout);
    b, gamma, beta, running_mean, running_var: [H].  Returns [B, H] f32.
    """
    B, F_in = x.shape
    H = w.shape[0]

    # ---- parameter prep (inference constants, folded outside the kernel) ----
    scale = gamma / jnp.sqrt(running_var + eps)          # exact reference math
    shift = beta - running_mean * scale

    Hp = _round_up(H, _LANE)       # lane-dense output width
    Bp = _round_up(B, _SUBLANE)    # sublane-aligned batch

    w_t = jnp.zeros((F_in, Hp), jnp.float32).at[:, :H].set(
        w.T.astype(jnp.float32))

    # Pack bias/scale/shift into one (8, Hp) tile: one BlockSpec, one DMA.
    params = jnp.zeros((_SUBLANE, Hp), jnp.float32)
    params = params.at[0, :H].set(b.astype(jnp.float32))
    params = params.at[1, :H].set(scale.astype(jnp.float32))
    params = params.at[2, :H].set(shift.astype(jnp.float32))

    x_p = x.astype(jnp.float32)
    if Bp != B:
        x_p = jnp.zeros((Bp, F_in), jnp.float32).at[:B, :].set(x_p)

    full = lambda shape: pl.BlockSpec(shape, lambda: tuple(0 for _ in shape))

    out = pl.pallas_call(
        subnet_bandpower_kernel,
        out_shape=jax.ShapeDtypeStruct((Bp, Hp), jnp.float32),
        grid_spec=pltpu.PrefetchScalarGridSpec(
            num_scalar_prefetch=0,
            grid=(),                        # tiny problem: single invocation
            in_specs=[
                full((Bp, F_in)),           # x
                full((F_in, Hp)),           # W^T, zero-padded columns
                full((_SUBLANE, Hp)),       # packed [bias; scale; shift]
            ],
            out_specs=full((Bp, Hp)),       # lane-dense (Hp % 128 == 0)
        ),
        compiler_params=pltpu.CompilerParams(),
    )(x_p, w_t, params)

    return out[:B, :H]


def reference(x, w, b, gamma, beta, running_mean, running_var, eps=_BN_EPS):
    y = jnp.maximum(x @ w.T + b, 0.0)
    return gamma * (y - running_mean) / jnp.sqrt(running_var + eps) + beta


if __name__ == "__main__":
    # Small shapes consistent with the module's forward: x is [batch, input_size]
    B = 8
    input_size_bandpower = 32
    hidden_size_bandpower = 64

    key = jax.random.PRNGKey(0)
    k_x, k_w, k_b, k_g, k_be, k_m, k_v = jax.random.split(key, 7)

    x = jax.random.normal(k_x, (B, input_size_bandpower), dtype=jnp.float32)

    # Deterministic parameter init (mimics nn.Linear's U(-1/sqrt(fan_in), +..))
    bound = 1.0 / jnp.sqrt(jnp.float32(input_size_bandpower))
    w = jax.random.uniform(k_w, (hidden_size_bandpower, input_size_bandpower),
                           minval=-bound, maxval=bound, dtype=jnp.float32)
    b = jax.random.uniform(k_b, (hidden_size_bandpower,),
                           minval=-bound, maxval=bound, dtype=jnp.float32)

    # BatchNorm1d parameters / running stats (non-trivial so BN does real work)
    gamma = 1.0 + 0.1 * jax.random.normal(k_g, (hidden_size_bandpower,),
                                          jnp.float32)
    beta = 0.1 * jax.random.normal(k_be, (hidden_size_bandpower,), jnp.float32)
    running_mean = 0.05 * jax.random.normal(k_m, (hidden_size_bandpower,),
                                            jnp.float32)
    running_var = 1.0 + 0.1 * jax.random.uniform(k_v, (hidden_size_bandpower,),
                                                 dtype=jnp.float32)

    out = subnetwork_bandpower(x, w, b, gamma, beta, running_mean, running_var)
    out = jax.block_until_ready(out)

    ref = reference(x, w, b, gamma, beta, running_mean, running_var)
    assert out.shape == (B, hidden_size_bandpower)
    assert jnp.allclose(out, ref, atol=1e-5, rtol=1e-5)

    print("KERNEL_OK")
</pallas_src>

<mosaic_0001>
module attributes {stable_mosaic.version = 11 : i64} {
  func.func @subnet_bandpower_kernel(%arg0: memref<8x32xf32, #tpu.memory_space<vmem>>, %arg1: memref<32x128xf32, #tpu.memory_space<vmem>>, %arg2: memref<8x128xf32, #tpu.memory_space<vmem>>, %arg3: memref<8x128xf32, #tpu.memory_space<vmem>>) attributes {dimension_semantics = [], scalar_prefetch = 0 : i64, scratch_operands = 0 : i64, tpu.core_type = #tpu.core_type<tc>} {
    %c0 = arith.constant 0 : index
    %c0_0 = arith.constant 0 : index
    %0 = vector.load %arg0[%c0, %c0_0] : memref<8x32xf32, #tpu.memory_space<vmem>>, vector<8x32xf32>
    %c0_1 = arith.constant 0 : index
    %c0_2 = arith.constant 0 : index
    %1 = vector.load %arg1[%c0_1, %c0_2] : memref<32x128xf32, #tpu.memory_space<vmem>>, vector<32x128xf32>
    %cst = arith.constant dense<0.000000e+00> : vector<8x128xf32>
    %2 = tpu.matmul %0, %1, %cst {dimension_numbers = #tpu.dot_dimension_numbers<[1], [0], [0], [1], [0, 0, 1, 1], [], []>} : vector<8x32xf32>, vector<32x128xf32>, vector<8x128xf32> -> vector<8x128xf32>
    %c0_3 = arith.constant 0 : index
    %c0_4 = arith.constant 0 : index
    %3 = vector.load %arg2[%c0_3, %c0_4] : memref<8x128xf32, #tpu.memory_space<vmem>>, vector<1x128xf32>
    %c1 = arith.constant 1 : index
    %c0_5 = arith.constant 0 : index
    %4 = vector.load %arg2[%c1, %c0_5] : memref<8x128xf32, #tpu.memory_space<vmem>>, vector<1x128xf32>
    %c2 = arith.constant 2 : index
    %c0_6 = arith.constant 0 : index
    %5 = vector.load %arg2[%c2, %c0_6] : memref<8x128xf32, #tpu.memory_space<vmem>>, vector<1x128xf32>
    %6 = vector.broadcast %3 : vector<1x128xf32> to vector<8x128xf32>
    %7 = arith.addf %2, %6 : vector<8x128xf32>
    %cst_7 = arith.constant 0.000000e+00 : f32
    %8 = vector.broadcast %cst_7 : f32 to vector<8x128xf32>
    %9 = arith.maximumf %7, %8 : vector<8x128xf32>
    %10 = vector.broadcast %4 : vector<1x128xf32> to vector<8x128xf32>
    %11 = arith.mulf %9, %10 : vector<8x128xf32>
    %12 = vector.broadcast %5 : vector<1x128xf32> to vector<8x128xf32>
    %13 = arith.addf %11, %12 : vector<8x128xf32>
    %c0_8 = arith.constant 0 : index
    %c0_9 = arith.constant 0 : index
    %14 = vector.load %arg3[%c0_8, %c0_9] : memref<8x128xf32, #tpu.memory_space<vmem>>, vector<8x128xf32>
    tpu.vector_store %arg3[%c0_8, %c0_9], %13 {strides = array<i32>} : memref<8x128xf32, #tpu.memory_space<vmem>>, vector<8x128xf32>,
    return
  }
}

</mosaic_0001>

<bundles_post_ra>
// kernel: tpu_custom_call.1
= control target key start
LH: loop header
LB: loop body
LE: loop exit
PB: predicated region body
PF: predicated region fallthrough
CT: control target
= control target key end

     0   :  { %8 = vsyncpa [#allocation3], 0  ;;  %s372_s0 = inlined_call_operand.hbm [shape: f32[8,32], index: 0, kind: input, shape index: {}]   ;;  %s373_s1 = inlined_call_operand.hbm [shape: f32[32,128], index: 1, kind: input, shape index: {}]   ;;  %s374_s2 = inlined_call_operand.hbm [shape: f32[8,128], index: 2, kind: input, shape index: {}]   ;;  %s375_s3 = inlined_call_operand.hbm [shape: f32[8,128], index: 3, kind: output, shape index: {}]  }
   0x1   :  { %9 = vsyncpa [#allocation6], 0 }
   0x2   :  { %10 = vsyncpa [#allocation4], 0  ;;  %s295_s12 = smov [#allocation5]   ;;  %s201_s16 = scalar_lea.hbm %s373_s1, 512 }
   0x3   :  { %s26_s13 = sshll.u32 %s295_s12, 4  ;;  %p202_p0 = scmp.ne.s32.totalorder %s373_s1, %s201_s16  ;;  %s27_s13 = int_to_ptr.vmem [resolvable:$true] %s26_s13 }
   0x4   :  { %p205_p1 = scmp.lt.u32.totalorder %s201_s16, %s373_s1 }
   0x6   :  { %p207_p2 = pnand %p205_p1, %p202_p0 }
   0x8   :  { %210 = shalt.err (!%p207_p2)
}
   0x9   :  { %s211_s21 = scalar_lea.vmem %s27_s13, 512  ;;  %p216_p4 = scmp.lt.s32.totalorder %s27_s13, %s27_s13 }
   0xa   :  { %p212_p3 = scmp.ne.s32.totalorder %s27_s13, %s211_s21  ;;  %p217_p5 = scmp.lt.s32.totalorder %s211_s21, %s211_s21 }
   0xc   :  { %p218_p6 = por %p217_p5, %p216_p4 }
   0xe   :  { %p219_p7 = pnand %p218_p6, %p212_p3 }
  0x10   :  { %222 = shalt.err (!%p219_p7)
}
  0x11   :  { %s296_s22 = smov 128   ;;  %s297_s23 = smov 8  }
  0x12   :  { %32 = dma.hbm_to_vmem [thread:$0]  %s373_s1, 512, %s27_s13, [#allocation6], %s296_s22, %s296_s22, %s297_s23  }
  0x13   :  { %s298_s26 = smov [#allocation2]   ;;  %s299_s28 = smov [#allocation7]  }
  0x14   :  { %s17_s27 = sshll.u32 %s298_s26, 4  ;;  %s39_s29 = sshll.u32 %s299_s28, 4  ;;  %s18_s27 = int_to_ptr.vmem [resolvable:$true] %s17_s27  ;;  %s40_s29 = int_to_ptr.vmem [resolvable:$true] %s39_s29 }
  0x15   :  { %s223_s5 = scalar_lea.hbm %s372_s0, 128 }
  0x16   :  { %p224_p8 = scmp.ne.s32.totalorder %s372_s0, %s223_s5  ;;  %p227_p9 = scmp.lt.u32.totalorder %s223_s5, %s372_s0 }
  0x18   :  { %p229_p10 = pnand %p227_p9, %p224_p8 }
  0x1a   :  { %232 = shalt.err (!%p229_p10)
}
  0x1b   :  { %s233_s1 = scalar_lea.vmem %s18_s27, 128  ;;  %p238_p12 = scmp.lt.s32.totalorder %s18_s27, %s18_s27 }
  0x1c   :  { %p234_p11 = scmp.ne.s32.totalorder %s18_s27, %s233_s1  ;;  %p239_p13 = scmp.lt.s32.totalorder %s233_s1, %s233_s1 }
  0x1e   :  { %p240_p0 = por %p239_p13, %p238_p12 }
  0x20   :  { %p241_p1 = pnand %p240_p0, %p234_p11 }
  0x22   :  { %244 = shalt.err (!%p241_p1)
}
  0x23   :  { %20 = dma.hbm_to_vmem [thread:$0]  %s372_s0, 128, %s18_s27, [#allocation3]  }
  0x24   :  { %s245_s14 = scalar_lea.hbm %s374_s2, 128 }
  0x25   :  { %p246_p2 = scmp.ne.s32.totalorder %s374_s2, %s245_s14  ;;  %p249_p3 = scmp.lt.u32.totalorder %s245_s14, %s374_s2 }
  0x27   :  { %p251_p4 = pnand %p249_p3, %p246_p2 }
  0x29   :  { %254 = shalt.err (!%p251_p4)
}
  0x2a   :  { %s255_s19 = scalar_lea.vmem %s40_s29, 128  ;;  %p260_p6 = scmp.lt.s32.totalorder %s40_s29, %s40_s29 }
  0x2b   :  { %p256_p5 = scmp.ne.s32.totalorder %s40_s29, %s255_s19  ;;  %p261_p7 = scmp.lt.s32.totalorder %s255_s19, %s255_s19 }
  0x2d   :  { %p262_p8 = por %p261_p7, %p260_p6 }
  0x2f   :  { %p263_p9 = pnand %p262_p8, %p256_p5 }
  0x31   :  { %266 = shalt.err (!%p263_p9)
}
  0x32   :  { %42 = dma.hbm_to_vmem [thread:$0]  %s374_s2, 128, %s40_s29, [#allocation6]  }
  0x33   :  { %289 = dma.done.wait [#allocation3], 128  }
  0x34   :  { %290 = vsyncadd [#allocation3], 4294967168 }
  0x35   :  { %291 = dma.done.wait [#allocation6], 640  }
  0x36   :  { %292 = vsyncadd [#allocation6], 4294966656  ;;  %v300_v0 = vmov 0.0|0.0   ;;  %vm301_vm0 = vmmov 0   ;;  %v302_v1 = vmov 0.0   ;;  %v53_v2 = vld [vmem:[#allocation5] sm:$0xff] }
  0x37   :  { %186 = vmatprep.subr.bf16.mxu0 %v300_v0  ;;  %183 = vmatprep.mubr.msk.f32.mxu0 %vm301_vm0, %v302_v1  ;;  %v54_v3 = vld [vmem:[#allocation5 + $0x8] sm:$0xff]  ;;  %v55_v4 = vld [vmem:[#allocation5 + $0x10] sm:$0xff]  ;;  %v56_v6 = vld [vmem:[#allocation5 + $0x18] sm:$0xff]  ;;  %vm64_vm1 = vcmask 261120   ;;  %s303_s2 = smov [#allocation8]  }
  0x38   :  { %v187_v5 = vpack.c.bf16 %v54_v3, %v53_v2  ;;  %v190_v7 = vpack.c.bf16 %v56_v6, %v55_v4  ;;  %v52_v8 = vld [vmem:[#allocation2] sm:$0xff]  ;;  %v166_v9 = vld [vmem:[#allocation7] ss:$0 sm:$0xff]  ;;  %v168_v13 = vld [vmem:[#allocation7 + $0x1] ss:$0 sm:$0xff]  ;;  %s156_s21 = sshll.u32 %s303_s2, 4  ;;  %s157_s21 = int_to_ptr.vmem [resolvable:$true] %s156_s21 }
  0x39   :  { %v169_v15 = vld [vmem:[#allocation7 + $0x2] ss:$0 sm:$0xff]  ;;  %s267_s22 = scalar_lea.vmem %s157_s21, 128  ;;  %p272_p11 = scmp.lt.s32.totalorder %s157_s21, %s157_s21 }
  0x3a   :  { %188 = vmatpush3.bf16.msra.mxu0 %v187_v5  ;;  %p268_p10 = scmp.ne.s32.totalorder %s157_s21, %s267_s22  ;;  %p273_p12 = scmp.lt.s32.totalorder %s267_s22, %s267_s22 }
  0x3b   :  { %189 = vmatprep.subr.bf16.mxu0 %v300_v0 }
  0x3c   :  { %p274_p13 = por %p273_p12, %p272_p11 }
  0x3e   :  { %191 = vmatpush3.bf16.msra.mxu0 %v190_v7  ;;  %p275_p0 = pnand %p274_p13, %p268_p10 }
  0x41   :  { %184 = vmatmul.mubr.msk.f32.vlgmr.msra.gmra.mrb[0].mxu0 %vm64_vm1, %v52_v8 }
 0x114   :  { %v134_v10 = vpop.f32.mrb[0].mxu0 }
 0x115   :  { %v135_v11 = vadd.f32 %v166_v9, %v134_v10  ;;  %v185_v12 = vpop.f32.mrb[1].mxu0 }
 0x117   :  { %v138_v14 = vmax.f32 %v135_v11, 0.0 }
 0x119   :  { %v143_v16 = vmul.f32 %v168_v13, %v138_v14 }
 0x11b   :  { %v148_v17 = vadd.f32 %v169_v15, %v143_v16 }
 0x11d   :  { %149 = vst [vmem:[#allocation8] sm:$0xff] %v148_v17 }
 0x11e   :  { %278 = shalt.err (!%p275_p0)
}
 0x11f   :  { %s279_s25 = scalar_lea.hbm %s375_s3, 128 }
 0x120   :  { %p280_p1 = scmp.ne.s32.totalorder %s375_s3, %s279_s25  ;;  %p283_p2 = scmp.lt.u32.totalorder %s279_s25, %s375_s3 }
 0x122   :  { %p285_p3 = pnand %p283_p2, %p280_p1 }
 0x124   :  { %288 = shalt.err (!%p285_p3)
}
 0x125   :  { %159 = dma.vmem_to_hbm [thread:$0]  %s157_s21, 128, %s375_s3, [#allocation4]  }
 0x126   :  { %293 = dma.done.wait [#allocation4], 128  }
 0x127   :  { %294 = vsyncadd [#allocation4], 4294967168 }
 0x128   :  { %163 = vsyncpa [#allocation3], 1 }
 0x129   :  { %164 = vsyncpa [#allocation6], 1 }
 0x12a   :  { %165 = vsyncpa [#allocation4], 1 }

</bundles_post_ra>
